<compile_context>
chip_gen: v7x
topology: tpu7x:2x2x1
jax: 0.10.0
libtpu: 0.0.40
codegen_flags: <defaults>
</compile_context>

<pallas_src>
import functools

import jax
import jax.numpy as jnp
from jax.experimental import pallas as pl
from jax.experimental.pallas import tpu as pltpu


# ---------------------------------------------------------------------------
# Pallas kernel: one K-tile of neg logits.
# ---------------------------------------------------------------------------
def _moco_neg_kernel(q_ref, queue_ref, neg_ref, *, inv_t):
    # q_ref:     (rows, n_dim) f32  -- resident across all K tiles (fetched once)
    # queue_ref: (tk,   n_dim) bf16 -- current memory-bank tile (the HBM stream)
    # neg_ref:   (rows, tk)    f32  -- output tile (lane-dense)
    #
    # Scale the small q block (rows*n_dim) instead of the big output tile
    # (rows*tk), then cast to the queue dtype so the MXU runs native bf16.
    q_scaled = (q_ref[...] * inv_t).astype(queue_ref.dtype)
    neg_ref[...] = jax.lax.dot_general(
        q_scaled,
        queue_ref[...],
        dimension_numbers=(((1,), (1,)), ((), ())),  # contract last dims -> no .T
        preferred_element_type=jnp.float32,
    )


@functools.lru_cache(maxsize=1)
def _tpu_tuning():
    """Return (tile_budget_bytes, vmem_limit_bytes, tk_max) gated on per-core VMEM."""
    vmem_cap = 64 * 1024 * 1024  # conservative default (v7x-sized)
    try:
        vmem_cap = int(pltpu.get_tpu_info().vmem_capacity_bytes)
    except Exception:
        pass
    if vmem_cap >= 100 * 1024 * 1024:
        # v5e / v6e: 128 MiB VMEM -> bigger tiles, fewer grid steps.
        return 24 * 1024 * 1024, 64 * 1024 * 1024, 8192
    # v7x: 64 MiB VMEM per TensorCore -> smaller tk so each core keeps >=8 steps.
    return 10 * 1024 * 1024, 32 * 1024 * 1024, 4096


def _pick_tk(K, n_dim, rows, queue_itemsize, budget_bytes, tk_max):
    """Largest K-tile that fits the VMEM budget (double-buffered in + out)."""

    def tile_bytes(tk):
        return (2 * tk * n_dim * queue_itemsize   # double-buffered queue tile (bf16)
                + 2 * rows * tk * 4               # double-buffered f32 output tile
                + rows * n_dim * 4)               # resident q block

    tk = min(tk_max, K)
    while tk > 128 and tile_bytes(tk) > budget_bytes:
        tk //= 2
    # Prefer a tile that divides K exactly (K is typically a power of two);
    # otherwise fall back to a cdiv grid with a masked final tile.
    t = tk
    while t > 128 and K % t != 0:
        t //= 2
    if K % t == 0:
        tk = t
    # Lane alignment: tile must be a multiple of 128 or the full K dimension.
    if tk != K and tk % 128 != 0:
        tk = min(K, 128)
    return tk


def _compute_neg_pallas(q, queue, inv_t, tk=None):
    """neg = (q @ queue^T) / T, tiled along the memory-bank dimension."""
    rows, n_dim = q.shape
    K = queue.shape[0]
    budget, vmem_limit, tk_max = _tpu_tuning()
    if tk is None:
        tk = _pick_tk(K, n_dim, rows, jnp.dtype(queue.dtype).itemsize, budget, tk_max)

    kernel = functools.partial(_moco_neg_kernel, inv_t=float(inv_t))

    neg = pl.pallas_call(
        kernel,
        out_shape=jax.ShapeDtypeStruct((rows, K), jnp.float32),
        grid_spec=pltpu.PrefetchScalarGridSpec(
            num_scalar_prefetch=0,
            grid=(pl.cdiv(K, tk),),
            in_specs=[
                pl.BlockSpec((rows, n_dim), lambda j: (0, 0)),  # q (resident)
                pl.BlockSpec((tk, n_dim), lambda j: (j, 0)),    # queue tile (streamed)
            ],
            out_specs=pl.BlockSpec((rows, tk), lambda j: (0, j)),
        ),
        compiler_params=pltpu.CompilerParams(
            # Output tiles are disjoint per j -> safe to shard across cores.
            dimension_semantics=("parallel",),
            vmem_limit_bytes=vmem_limit,
        ),
    )(q, queue)
    return neg


# ---------------------------------------------------------------------------
# In-place (donated) memory-bank update.
# ---------------------------------------------------------------------------
@functools.partial(jax.jit, donate_argnums=(0,))
def _update_memory_donated(memory, all_k, index):
    # Wrap-around index_copy as a scatter on a donated buffer: executes in place,
    # and `index` is a traced scalar so advancing the pointer never retraces.
    num_neg = all_k.shape[0]
    ids = (index + jnp.arange(num_neg, dtype=jnp.int32)) % memory.shape[0]
    return memory.at[ids].set(all_k.astype(memory.dtype))


# ---------------------------------------------------------------------------
# JAX/Pallas port of RGBMoCo.
# ---------------------------------------------------------------------------
class RGBMoCoPallas:
    """Single-modal MoCo-style memory cache (forward pass uses a Pallas kernel)."""

    def __init__(self, n_dim, K=65536, T=0.07, seed=0, mem_dtype=jnp.bfloat16):
        self.K = K
        self.T = T
        self.index = 0
        key = jax.random.PRNGKey(seed)
        mem = jax.random.normal(key, (K, n_dim), dtype=jnp.float32)
        # F.normalize: row-wise L2 normalization (in f32), then store bf16:
        # the neg matmul is HBM-bandwidth bound, so halving the streamed bytes
        # is the dominant win; accumulation stays f32 inside the kernel.
        mem = mem / jnp.maximum(jnp.linalg.norm(mem, axis=1, keepdims=True), 1e-12)
        self.memory = mem.astype(mem_dtype)

    def _update_memory(self, all_k):
        self.memory = _update_memory_donated(
            self.memory, all_k, jnp.int32(self.index))

    def _update_pointer(self, bsz):
        self.index = (self.index + bsz) % self.K

    def __call__(self, q, k, q_jig=None, all_k=None):
        bsz = q.shape[0]
        k = jax.lax.stop_gradient(k)
        inv_t = 1.0 / self.T
        queue = self.memory  # bf16 snapshot; logits read pre-update rows

        # Fuse q and q_jig into one pass over the memory bank.
        if q_jig is not None:
            qq = jnp.concatenate([q, q_jig], axis=0).astype(jnp.float32)
            kk = jnp.concatenate([k, k], axis=0).astype(jnp.float32)
        else:
            qq = q.astype(jnp.float32)
            kk = k.astype(jnp.float32)

        # neg: Pallas kernel (streams the whole memory bank once, bf16, scaled by 1/T).
        neg_all = _compute_neg_pallas(qq, queue, inv_t)            # (rows, K) f32
        # pos: O(rows * n_dim), trivially cheap -> plain JAX (kept in f32).
        pos_all = jnp.sum(qq * kk, axis=-1, keepdims=True) * inv_t

        # TODO(synk): return (pos, neg) or an in-kernel fused logsumexp for CE
        # losses; this concatenate only preserves the torch (bsz, 1+K) layout.
        logits_all = jnp.concatenate([pos_all, neg_all], axis=1)   # (rows, 1+K)

        # torch.long -> int64; int32 labels are fine for JAX loss functions.
        labels = jnp.zeros((bsz,), dtype=jnp.int32)

        all_k = k if all_k is None else all_k
        self._update_memory(all_k)
        self._update_pointer(all_k.shape[0])

        if q_jig is not None:
            return logits_all[:bsz], logits_all[bsz:], labels
        return logits_all, labels


# ---------------------------------------------------------------------------
# Reference + self-test
# ---------------------------------------------------------------------------
def _reference_logits(q, k, queue_f32, T):
    """Reference with the same bf16 quantization the kernel applies."""
    inv_t = 1.0 / T
    q_s = (q * inv_t).astype(jnp.bfloat16).astype(jnp.float32)
    neg = q_s @ queue_f32.T
    pos = jnp.sum(q * k, axis=-1, keepdims=True) * inv_t
    return jnp.concatenate([pos, neg], axis=1)


if __name__ == "__main__":
    # Small deterministic shapes: bsz=8, n_dim=32, memory bank K=256.
    bsz, n_dim, K = 8, 32, 256
    key = jax.random.PRNGKey(0)
    kq, kk_, kj, km = jax.random.split(key, 4)

    def l2norm(x):
        return x / jnp.maximum(jnp.linalg.norm(x, axis=1, keepdims=True), 1e-12)

    q = l2norm(jax.random.normal(kq, (bsz, n_dim), dtype=jnp.float32))
    k = l2norm(jax.random.normal(kk_, (bsz, n_dim), dtype=jnp.float32))
    q_jig = l2norm(jax.random.normal(kj, (bsz, n_dim), dtype=jnp.float32))

    moco = RGBMoCoPallas(n_dim=n_dim, K=K, T=0.07, seed=0)
    # Snapshot BEFORE the forward (the bank buffer is donated by the update).
    queue_before = moco.memory.astype(jnp.float32)

    logits, logits_jig, labels = moco(q, k, q_jig=q_jig)
    jax.block_until_ready((logits, logits_jig, labels, moco.memory))

    # Correctness checks against a pure-JAX reference (same bf16 quantization).
    ref = _reference_logits(q, k, queue_before, 0.07)
    ref_jig = _reference_logits(q_jig, k, queue_before, 0.07)
    assert logits.shape == (bsz, 1 + K)
    assert logits_jig.shape == (bsz, 1 + K)
    assert labels.shape == (bsz,) and int(labels.sum()) == 0
    assert jnp.allclose(logits, ref, atol=1e-2, rtol=1e-2)
    assert jnp.allclose(logits_jig, ref_jig, atol=1e-2, rtol=1e-2)
    # Memory update: first bsz rows replaced by k (bf16), pointer advanced.
    assert jnp.allclose(moco.memory[:bsz].astype(jnp.float32), k, atol=1e-2, rtol=1e-2)
    assert moco.index == bsz

    # No-jigsaw path.
    logits2, labels2 = moco(q, k)
    jax.block_until_ready((logits2, labels2))
    assert logits2.shape == (bsz, 1 + K)
    assert moco.index == 2 * bsz

    # Wrap-around pointer update.
    moco2 = RGBMoCoPallas(n_dim=n_dim, K=16, T=0.07, seed=1)
    moco2.index = 12
    _ = moco2(q, k)
    jax.block_until_ready(moco2.memory)
    mem2 = moco2.memory.astype(jnp.float32)
    assert jnp.allclose(mem2[12:16], k[:4], atol=1e-2, rtol=1e-2)
    assert jnp.allclose(mem2[0:4], k[4:8], atol=1e-2, rtol=1e-2)
    assert moco2.index == (12 + bsz) % 16

    # Non-divisible K with a forced small tile: exercises the masked final block.
    Kp = 320
    qmem = l2norm(jax.random.normal(km, (Kp, n_dim), dtype=jnp.float32))
    qmem_bf = qmem.astype(jnp.bfloat16)
    neg_p = _compute_neg_pallas(q, qmem_bf, 1.0 / 0.07, tk=128)
    jax.block_until_ready(neg_p)
    q_s = (q * (1.0 / 0.07)).astype(jnp.bfloat16).astype(jnp.float32)
    ref_p = q_s @ qmem_bf.astype(jnp.float32).T
    assert neg_p.shape == (bsz, Kp)
    assert jnp.allclose(neg_p, ref_p, atol=1e-2, rtol=1e-2)

    print("KERNEL_OK")
</pallas_src>

<mosaic_0001>
module attributes {stable_mosaic.version = 11 : i64} {
  func.func @_moco_neg_kernel(%arg0: i32, %arg1: memref<16x32xf32, #tpu.memory_space<vmem>>, %arg2: memref<256x32xbf16, #tpu.memory_space<vmem>>, %arg3: memref<16x256xf32, #tpu.memory_space<vmem>>) attributes {dimension_semantics = [#tpu.dimension_semantics<parallel>], iteration_bounds = array<i64: 1>, scalar_prefetch = 0 : i64, scratch_operands = 0 : i64, tpu.core_type = #tpu.core_type<tc>, window_params = [{pipeline_mode = #tpu.pipeline_mode<synchronous>, transform_indices = @transform_0, window_bounds = array<i64: 16, 32>}, {transform_indices = @transform_1, window_bounds = array<i64: 256, 32>}, {transform_indices = @transform_2, window_bounds = array<i64: 16, 256>}]} {
    %c0 = arith.constant 0 : index
    %c0_0 = arith.constant 0 : index
    %0 = vector.load %arg1[%c0, %c0_0] : memref<16x32xf32, #tpu.memory_space<vmem>>, vector<16x32xf32>
    %cst = arith.constant 14.2857141 : f32
    %1 = vector.broadcast %cst : f32 to vector<16x32xf32>
    %2 = arith.mulf %0, %1 : vector<16x32xf32>
    %3 = arith.truncf %2 : vector<16x32xf32> to vector<16x32xbf16>
    %c0_1 = arith.constant 0 : index
    %c0_2 = arith.constant 0 : index
    %4 = vector.load %arg2[%c0_1, %c0_2] : memref<256x32xbf16, #tpu.memory_space<vmem>>, vector<256x32xbf16>
    %cst_3 = arith.constant dense<0.000000e+00> : vector<16x256xf32>
    %5 = tpu.matmul %3, %4, %cst_3 {dimension_numbers = #tpu.dot_dimension_numbers<[1], [1], [0], [0], [0, 0, 1, 0], [], []>} : vector<16x32xbf16>, vector<256x32xbf16>, vector<16x256xf32> -> vector<16x256xf32>
    %c0_4 = arith.constant 0 : index
    %c0_5 = arith.constant 0 : index
    %6 = vector.load %arg3[%c0_4, %c0_5] : memref<16x256xf32, #tpu.memory_space<vmem>>, vector<16x256xf32>
    tpu.vector_store %arg3[%c0_4, %c0_5], %5 {strides = array<i32>} : memref<16x256xf32, #tpu.memory_space<vmem>>, vector<16x256xf32>,
    return
  }
  func.func @transform_0(%arg0: i32) -> (i32, i32) {
    %c0_i32 = arith.constant 0 : i32
    %c0_i32_0 = arith.constant 0 : i32
    %c0_i32_1 = arith.constant 0 : i32
    return %c0_i32, %c0_i32_0 : i32, i32
  }
  func.func @transform_1(%arg0: i32) -> (i32, i32) {
    %c0_i32 = arith.constant 0 : i32
    %c0_i32_0 = arith.constant 0 : i32
    return %arg0, %c0_i32 : i32, i32
  }
  func.func @transform_2(%arg0: i32) -> (i32, i32) {
    %c0_i32 = arith.constant 0 : i32
    %c0_i32_0 = arith.constant 0 : i32
    return %c0_i32, %arg0 : i32, i32
  }
}

</mosaic_0001>

<bundles_post_ra>
// kernel: tpu_custom_call.1
= control target key start
LH: loop header
LB: loop body
LE: loop exit
PB: predicated region body
PF: predicated region fallthrough
CT: control target
= control target key end

     0   :  { %vm130_vm0 = vcmask 261120   ;;  %s433_s0 = inlined_call_operand.vmem [shape: f32[16,32], index: 0, kind: input, shape index: {}]   ;;  %s434_s1 = inlined_call_operand.vmem [shape: bf16[256,32], index: 1, kind: input, shape index: {}]   ;;  %s435_s2 = inlined_call_operand.hbm [shape: f32[16,256], index: 2, kind: output, shape index: {}]  }
   0x1   :  { %v291_v0 = vld [vmem:[%s434_s1 + $0x40] sm:$0xff]   ;;  %v293_v2 = vld [vmem:[%s434_s1 + $0x48] sm:$0xff]   ;;  %v295_v6 = vld [vmem:[%s434_s1 + $0x50] sm:$0xff]  }
   0x2   :  { %v292_v1 = vld [vmem:[%s434_s1] sm:$0xff]   ;;  %280 = vmatprep.subr.msk.bf16.mxu0 %vm130_vm0, %v291_v0  ;;  %v294_v4 = vld [vmem:[%s434_s1 + $0x8] sm:$0xff]   ;;  %v296_v7 = vld [vmem:[%s434_s1 + $0x10] sm:$0xff]  }
   0x3   :  { %v135_v3 = vsel %vm130_vm0, %v292_v1, 0  ;;  %v138_v5 = vsel %vm130_vm0, %v294_v4, 0  ;;  %v13_v8 = vld [vmem:[%s433_s0] sm:$0xff]  ;;  %v14_v9 = vld [vmem:[%s433_s0 + $0x8] sm:$0xff] }
   0x4   :  { %263 = vmatpush3.bf16.xpose.msra.mxu0 %v135_v3 }
   0x5   :  { %281 = vmatprep.subr.msk.bf16.mxu0 %vm130_vm0, %v293_v2 }
   0xc   :  { %265 = vmatpush3.bf16.xpose.msra.mxu0 %v138_v5 }
   0xd   :  { %282 = vmatprep.subr.msk.bf16.mxu0 %vm130_vm0, %v295_v6 }
   0xe   :  { %7 = vsyncpa [#allocation3], 0  ;;  %v141_v10 = vsel %vm130_vm0, %v296_v7, 0  ;;  %v297_v11 = vld [vmem:[%s434_s1 + $0x58] sm:$0xff]   ;;  %v15_v12 = vmul.f32 14.285714, %v13_v8 }
   0xf   :  { %v16_v13 = vmul.f32 14.285714, %v14_v9  ;;  %v298_v15 = vld [vmem:[%s434_s1 + $0x18] sm:$0xff]   ;;  %v299_v17 = vld [vmem:[%s434_s1 + $0x60] sm:$0xff]   ;;  %v301_v20 = vld [vmem:[%s434_s1 + $0x68] sm:$0xff]   ;;  %s331_s16 = smov [#allocation2]  }
  0x10   :  { %v144_v16 = vsel %vm130_vm0, %v298_v15, 0  ;;  %v300_v18 = vld [vmem:[%s434_s1 + $0x20] sm:$0xff]   ;;  %v302_v21 = vld [vmem:[%s434_s1 + $0x28] sm:$0xff]   ;;  %v303_v23 = vld [vmem:[%s434_s1 + $0x70] sm:$0xff]   ;;  %s234_s17 = sshll.u32 %s331_s16, 4  ;;  %s235_s17 = int_to_ptr.vmem [resolvable:$true] %s234_s17 }
  0x11   :  { %v17_v14 = vpack.c.bf16 %v16_v13, %v15_v12  ;;  %v147_v19 = vsel %vm130_vm0, %v300_v18, 0  ;;  %v150_v22 = vsel %vm130_vm0, %v302_v21, 0  ;;  %v304_v24 = vld [vmem:[%s434_s1 + $0x30] sm:$0xff]   ;;  %v305_v26 = vld [vmem:[%s434_s1 + $0x78] sm:$0xff]   ;;  %s307_s18 = scalar_lea.vmem %s235_s17, 512  ;;  %p312_p1 = scmp.lt.s32.totalorder %s235_s17, %s235_s17 }
  0x12   :  { %v153_v25 = vsel %vm130_vm0, %v304_v24, 0  ;;  %v306_v27 = vld [vmem:[%s434_s1 + $0x38] sm:$0xff]   ;;  %p308_p0 = scmp.ne.s32.totalorder %s235_s17, %s307_s18  ;;  %p313_p2 = scmp.lt.s32.totalorder %s307_s18, %s307_s18 }
  0x13   :  { %278 = vmatprep.mubr.msk.bf16.mxu0 %vm130_vm0, %v17_v14  ;;  %v156_v28 = vsel %vm130_vm0, %v306_v27, 0 }
  0x14   :  { %267 = vmatpush3.bf16.xpose.msra.mxu0 %v141_v10  ;;  %p314_p3 = por %p313_p2, %p312_p1 }
  0x15   :  { %283 = vmatprep.subr.msk.bf16.mxu0 %vm130_vm0, %v297_v11 }
  0x16   :  { %p315_p4 = pnand %p314_p3, %p308_p0 }
  0x1c   :  { %269 = vmatpush3.bf16.xpose.msra.mxu0 %v144_v16 }
  0x1d   :  { %284 = vmatprep.subr.msk.bf16.mxu0 %vm130_vm0, %v299_v17 }
  0x24   :  { %271 = vmatpush3.bf16.xpose.msra.mxu0 %v147_v19 }
  0x25   :  { %285 = vmatprep.subr.msk.bf16.mxu0 %vm130_vm0, %v301_v20 }
  0x2c   :  { %273 = vmatpush3.bf16.xpose.msra.mxu0 %v150_v22 }
  0x2d   :  { %286 = vmatprep.subr.msk.bf16.mxu0 %vm130_vm0, %v303_v23 }
  0x34   :  { %275 = vmatpush3.bf16.xpose.msra.mxu0 %v153_v25 }
  0x35   :  { %287 = vmatprep.subr.msk.bf16.mxu0 %vm130_vm0, %v305_v26 }
  0x3c   :  { %277 = vmatpush3.bf16.xpose.msra.mxu0 %v156_v28 }
  0x43   :  { %279 = vmatmul.mubr.msk.bf16.vlgmr.msra.gmra.mrb[0].mxu0 %vm130_vm0, %v17_v14 }
 0x116   :  { %v216_v29 = vpop.f32.mrb[0].mxu0 }
 0x117   :  { %225 = vst [vmem:[#allocation2] sm:$0xff] %v216_v29  ;;  %v218_v30 = vpop.f32.mrb[1].mxu0 }
 0x118   :  { %226 = vst [vmem:[#allocation2 + $0x8] sm:$0xff] %v218_v30  ;;  %v220_v31 = vpop.f32.mrb[2].mxu0 }
 0x119   :  { %227 = vst [vmem:[#allocation2 + $0x10] sm:$0xff] %v220_v31  ;;  %v222_v32 = vpop.f32.mrb[3].mxu0 }
 0x11a   :  { %228 = vst [vmem:[#allocation2 + $0x18] sm:$0xff] %v222_v32 }
 0x11b   :  { %318 = shalt.err (!%p315_p4)
}
 0x11c   :  { %s319_s20 = scalar_lea.hbm %s435_s2, 512 }
 0x11d   :  { %p320_p5 = scmp.ne.s32.totalorder %s435_s2, %s319_s20  ;;  %p323_p6 = scmp.lt.u32.totalorder %s319_s20, %s435_s2 }
 0x11f   :  { %p325_p7 = pnand %p323_p6, %p320_p5 }
 0x121   :  { %328 = shalt.err (!%p325_p7)
}
 0x122   :  { %s332_s25 = smov 256   ;;  %s333_s26 = smov 16  }
 0x123   :  { %240 = dma.vmem_to_hbm [thread:$0]  %s235_s17, 512, %s435_s2, [#allocation3], %s332_s25, %s332_s25, %s333_s26  }
 0x124   :  { %329 = dma.done.wait [#allocation3], 512  }
 0x125   :  { %330 = vsyncadd [#allocation3], 4294966784 }
 0x126   :  { %244 = vsyncpa [#allocation3], 1 }

</bundles_post_ra>
